<compile_context>
chip_gen: v5e
topology: v5e:2x2
jax: 0.10.0
libtpu: 0.0.40
codegen_flags: <defaults>
</compile_context>

<pallas_src>
import jax
import jax.numpy as jnp
from jax.experimental import pallas as pl
from jax.experimental.pallas import tpu as pltpu


def _round_up(x, m):
    return (x + m - 1) // m * m


def _auto_row_tile(n, e_in, c, edge_itemsize, out_itemsize, budget_bytes):
    """Largest row tile TN (a multiple of 8, or N itself) dividing N whose
    per-step VMEM footprint (double-buffered blocks + f32 intermediates)
    fits in budget_bytes."""
    f32 = 4
    e_lanes = _round_up(e_in, 128)      # edge minor dim pads to 128 lanes
    c_lanes = _round_up(c, 128)
    n_sub = _round_up(n, 8)

    # tn-independent residents: node_j block + wz block (double-buffered).
    fixed = 2 * n_sub * c_lanes * f32 + 2 * _round_up(e_in, 8) * c_lanes * f32

    def step_bytes(tn):
        edge_b = 2 * tn * n_sub * e_lanes * edge_itemsize     # edge in block
        out_b = 2 * tn * n_sub * c_lanes * out_itemsize       # out block
        node_i_b = 2 * _round_up(tn, 8) * c_lanes * f32       # node_i block
        interm = 2 * tn * n_sub * c_lanes * f32               # edge_t + sum (f32)
        return fixed + edge_b + out_b + node_i_b + interm

    candidates = sorted({t for t in range(8, n + 1, 8) if n % t == 0} | {n})
    fitting = [t for t in candidates if step_bytes(t) <= budget_bytes]
    return max(fitting) if fitting else min(candidates)


def edge_merge_kernel(edge_ref, node_i_ref, node_j_ref, wz_ref, out_ref):
    # Block shapes (batch / row-tile leading dims squeezed via BlockSpec None):
    #   edge_ref:   (TN, N, E_in)
    #   node_i_ref: (TN, C) = (node @ wh + bh + bz)[b, row-tile]   (f32)
    #   node_j_ref: (N, C)  = (node @ wh + bh)[b, :]               (f32)
    #   wz_ref:     (E_in, C)   (constant index_map -> stays resident)
    #   out_ref:    (TN, N, C)
    tn, n, c = out_ref.shape
    e_in = edge_ref.shape[2]

    # Edge linear on the MXU.  Flatten (TN, N) -> rows; TN is a multiple of 8
    # (or == N), so this is a layout reinterpretation, not a relayout copy.
    e2 = edge_ref[...].reshape(tn * n, e_in)
    edge_t = jnp.dot(e2, wz_ref[...], preferred_element_type=jnp.float32)
    edge_t = edge_t.reshape(tn, n, c)

    # f32 accumulation; only the final store downcasts (matters for bf16 out).
    out = edge_t + node_i_ref[...][:, None, :] + node_j_ref[...][None, :, :]
    out_ref[...] = out.astype(out_ref.dtype)


def edge_merge(edge, node, wz, bz, wh, bh, *, row_tile=None, out_dtype=None,
               vmem_budget_bytes=12 * 1024 * 1024, vmem_limit_bytes=None):
    """edge: (B, N, N, E_in), node: (B, N, H_in).
    Weights stored transposed ((in, out)): wz: (E_in, C), wh: (H_in, C);
    biases bz, bh: (C,).

    out_dtype defaults to edge.dtype.  Pass jnp.bfloat16 to halve the
    dominant HBM writeback stream (adds remain f32 in-kernel)."""
    B, N, N2, e_in = edge.shape
    assert N == N2, "edge must be (B, N, N, E_in)"
    C = wz.shape[-1]
    out_dtype = edge.dtype if out_dtype is None else out_dtype

    tn = row_tile if row_tile is not None else _auto_row_tile(
        N, e_in, C, jnp.dtype(edge.dtype).itemsize,
        jnp.dtype(out_dtype).itemsize, vmem_budget_bytes)
    assert N % tn == 0, "row tile must divide N"
    assert tn == N or tn % 8 == 0, "row tile must be a multiple of 8 (or N)"

    # Node linear hoisted out of the kernel: tiny (B, N, C) f32 arrays.
    # bz folded into the row-node term (same numerics as adding bz once per
    # output element).
    node_t = (jnp.dot(node.astype(jnp.float32), wh.astype(jnp.float32))
              + bh.astype(jnp.float32))
    node_i_t = node_t + bz.astype(jnp.float32)
    node_j_t = node_t

    grid = (B, N // tn)

    return pl.pallas_call(
        edge_merge_kernel,
        out_shape=jax.ShapeDtypeStruct((B, N, N, C), out_dtype),
        grid_spec=pltpu.PrefetchScalarGridSpec(
            num_scalar_prefetch=0,
            grid=grid,
            in_specs=[
                # edge: tile the first N ("row") dim; batch dim squeezed.
                pl.BlockSpec((None, tn, N, e_in), lambda b, rt: (b, rt, 0, 0)),
                # node_i term: only the TN rows of the current tile.
                pl.BlockSpec((None, tn, C), lambda b, rt: (b, rt, 0)),
                # node_j term: all N column nodes of this batch.
                pl.BlockSpec((None, N, C), lambda b, rt: (b, 0, 0)),
                # edge weight: constant index_map, stays resident in VMEM.
                pl.BlockSpec((e_in, C), lambda b, rt: (0, 0)),
            ],
            out_specs=pl.BlockSpec((None, tn, N, C), lambda b, rt: (b, rt, 0, 0)),
        ),
        compiler_params=pltpu.CompilerParams(
            dimension_semantics=("parallel", "parallel"),
            vmem_limit_bytes=vmem_limit_bytes),
    )(edge, node_i_t, node_j_t, wz)


if __name__ == "__main__":
    # Small shapes consistent with the module's forward.
    B, N = 2, 16
    EDGE_IN, NODE_IN, OUT = 4, 6, 128

    key = jax.random.PRNGKey(0)
    k_e, k_n, k_wz, k_bz, k_wh, k_bh = jax.random.split(key, 6)

    edge = jax.random.normal(k_e, (B, N, N, EDGE_IN), dtype=jnp.float32)
    node = jax.random.normal(k_n, (B, N, NODE_IN), dtype=jnp.float32)

    # Linear weights stored transposed: (in, out).
    wz = jax.random.normal(k_wz, (EDGE_IN, OUT), dtype=jnp.float32) * 0.1
    bz = jax.random.normal(k_bz, (OUT,), dtype=jnp.float32) * 0.1
    wh = jax.random.normal(k_wh, (NODE_IN, OUT), dtype=jnp.float32) * 0.1
    bh = jax.random.normal(k_bh, (OUT,), dtype=jnp.float32) * 0.1

    # Pure-JAX reference.
    edge_t = edge @ wz + bz
    node_t = node @ wh + bh
    ref = edge_t + node_t[:, :, None, :] + node_t[:, None, :, :]

    # 1) f32 output, auto tile (collapses the row axis at these sizes).
    out = jax.block_until_ready(edge_merge(edge, node, wz, bz, wh, bh))
    assert out.shape == (B, N, N, OUT)
    assert jnp.allclose(out, ref, atol=1e-5, rtol=1e-5)

    # 2) Exercise the multi-row-tile grid path (grid = (B, 2)).
    out_tiled = jax.block_until_ready(
        edge_merge(edge, node, wz, bz, wh, bh, row_tile=8))
    assert jnp.allclose(out_tiled, ref, atol=1e-5, rtol=1e-5)

    # 3) bf16 output path (halves the dominant HBM writeback); adds stay f32
    #    in-kernel, only the final store downcasts.
    out_bf16 = jax.block_until_ready(
        edge_merge(edge, node, wz, bz, wh, bh, out_dtype=jnp.bfloat16))
    assert out_bf16.dtype == jnp.bfloat16
    assert jnp.allclose(out_bf16.astype(jnp.float32), ref, atol=5e-2, rtol=5e-2)

    print("KERNEL_OK")
</pallas_src>

<mosaic_0001>
module attributes {stable_mosaic.version = 11 : i64} {
  func.func @edge_merge_kernel(%arg0: i32, %arg1: i32, %arg2: memref<1x16x16x4xf32, #tpu.memory_space<vmem>>, %arg3: memref<1x16x128xf32, #tpu.memory_space<vmem>>, %arg4: memref<1x16x128xf32, #tpu.memory_space<vmem>>, %arg5: memref<4x128xf32, #tpu.memory_space<vmem>>, %arg6: memref<1x16x16x128xf32, #tpu.memory_space<vmem>>) attributes {dimension_semantics = [#tpu.dimension_semantics<parallel>, #tpu.dimension_semantics<parallel>], iteration_bounds = array<i64: 2, 1>, scalar_prefetch = 0 : i64, scratch_operands = 0 : i64, tpu.core_type = #tpu.core_type<tc>, window_params = [{transform_indices = @transform_0, window_bounds = array<i64: 1, 16, 16, 4>}, {transform_indices = @transform_1, window_bounds = array<i64: 1, 16, 128>}, {transform_indices = @transform_2, window_bounds = array<i64: 1, 16, 128>}, {pipeline_mode = #tpu.pipeline_mode<synchronous>, transform_indices = @transform_3, window_bounds = array<i64: 4, 128>}, {transform_indices = @transform_4, window_bounds = array<i64: 1, 16, 16, 128>}]} {
    %c0 = arith.constant 0 : index
    %c0_0 = arith.constant 0 : index
    %c0_1 = arith.constant 0 : index
    %c0_2 = arith.constant 0 : index
    %0 = vector.load %arg2[%c0, %c0_0, %c0_1, %c0_2] : memref<1x16x16x4xf32, #tpu.memory_space<vmem>>, vector<1x16x16x4xf32>
    %1 = vector.shape_cast %0 : vector<1x16x16x4xf32> to vector<16x16x4xf32>
    %2 = vector.shape_cast %1 : vector<16x16x4xf32> to vector<256x4xf32>
    %c0_3 = arith.constant 0 : index
    %c0_4 = arith.constant 0 : index
    %3 = vector.load %arg5[%c0_3, %c0_4] : memref<4x128xf32, #tpu.memory_space<vmem>>, vector<4x128xf32>
    %cst = arith.constant dense<0.000000e+00> : vector<256x128xf32>
    %4 = tpu.matmul %2, %3, %cst {dimension_numbers = #tpu.dot_dimension_numbers<[1], [0], [0], [1], [0, 0, 1, 1], [], []>} : vector<256x4xf32>, vector<4x128xf32>, vector<256x128xf32> -> vector<256x128xf32>
    %5 = vector.shape_cast %4 : vector<256x128xf32> to vector<16x16x128xf32>
    %c0_5 = arith.constant 0 : index
    %c0_6 = arith.constant 0 : index
    %c0_7 = arith.constant 0 : index
    %6 = vector.load %arg3[%c0_5, %c0_6, %c0_7] : memref<1x16x128xf32, #tpu.memory_space<vmem>>, vector<1x16x128xf32>
    %7 = vector.shape_cast %6 : vector<1x16x128xf32> to vector<16x128xf32>
    %8 = vector.shape_cast %7 : vector<16x128xf32> to vector<16x1x128xf32>
    %9 = vector.broadcast %8 : vector<16x1x128xf32> to vector<16x16x128xf32>
    %10 = arith.addf %5, %9 : vector<16x16x128xf32>
    %c0_8 = arith.constant 0 : index
    %c0_9 = arith.constant 0 : index
    %c0_10 = arith.constant 0 : index
    %11 = vector.load %arg4[%c0_8, %c0_9, %c0_10] : memref<1x16x128xf32, #tpu.memory_space<vmem>>, vector<1x16x128xf32>
    %12 = vector.shape_cast %11 : vector<1x16x128xf32> to vector<16x128xf32>
    %13 = vector.shape_cast %12 : vector<16x128xf32> to vector<1x16x128xf32>
    %14 = vector.broadcast %13 : vector<1x16x128xf32> to vector<16x16x128xf32>
    %15 = arith.addf %10, %14 : vector<16x16x128xf32>
    %c0_11 = arith.constant 0 : index
    %c0_12 = arith.constant 0 : index
    %c0_13 = arith.constant 0 : index
    %c0_14 = arith.constant 0 : index
    %16 = vector.load %arg6[%c0_11, %c0_12, %c0_13, %c0_14] : memref<1x16x16x128xf32, #tpu.memory_space<vmem>>, vector<1x16x16x128xf32>
    %17 = vector.shape_cast %16 : vector<1x16x16x128xf32> to vector<16x16x128xf32>
    %18 = vector.shape_cast %15 : vector<16x16x128xf32> to vector<1x16x16x128xf32>
    tpu.vector_store %arg6[%c0_11, %c0_12, %c0_13, %c0_14], %18 {strides = array<i32>} : memref<1x16x16x128xf32, #tpu.memory_space<vmem>>, vector<1x16x16x128xf32>,
    return
  }
  func.func @transform_0(%arg0: i32, %arg1: i32) -> (i32, i32, i32, i32) {
    %c0_i32 = arith.constant 0 : i32
    %c0_i32_0 = arith.constant 0 : i32
    %c0_i32_1 = arith.constant 0 : i32
    return %arg0, %arg1, %c0_i32, %c0_i32_0 : i32, i32, i32, i32
  }
  func.func @transform_1(%arg0: i32, %arg1: i32) -> (i32, i32, i32) {
    %c0_i32 = arith.constant 0 : i32
    %c0_i32_0 = arith.constant 0 : i32
    return %arg0, %arg1, %c0_i32 : i32, i32, i32
  }
  func.func @transform_2(%arg0: i32, %arg1: i32) -> (i32, i32, i32) {
    %c0_i32 = arith.constant 0 : i32
    %c0_i32_0 = arith.constant 0 : i32
    %c0_i32_1 = arith.constant 0 : i32
    return %arg0, %c0_i32, %c0_i32_0 : i32, i32, i32
  }
  func.func @transform_3(%arg0: i32, %arg1: i32) -> (i32, i32) {
    %c0_i32 = arith.constant 0 : i32
    %c0_i32_0 = arith.constant 0 : i32
    %c0_i32_1 = arith.constant 0 : i32
    return %c0_i32, %c0_i32_0 : i32, i32
  }
  func.func @transform_4(%arg0: i32, %arg1: i32) -> (i32, i32, i32, i32) {
    %c0_i32 = arith.constant 0 : i32
    %c0_i32_0 = arith.constant 0 : i32
    %c0_i32_1 = arith.constant 0 : i32
    return %arg0, %arg1, %c0_i32, %c0_i32_0 : i32, i32, i32, i32
  }
}

</mosaic_0001>

<bundles_post_ra>
// kernel: tpu_custom_call.1
= control target key start
LH: loop header
LB: loop body
LE: loop exit
PB: predicated region body
PF: predicated region fallthrough
CT: control target
= control target key end

     0   :  { %9 = vsyncpa [#allocation3], 0  ;;  %s1304_s0 = inlined_call_operand.vmem [shape: f32[2,16,16,4], index: 0, kind: input, shape index: {}]   ;;  %s1305_s1 = inlined_call_operand.vmem [shape: f32[2,16,128], index: 1, kind: input, shape index: {}]   ;;  %s1306_s2 = inlined_call_operand.vmem [shape: f32[2,16,128], index: 2, kind: input, shape index: {}]   ;;  %s1307_s3 = inlined_call_operand.vmem [shape: f32[4,128], index: 3, kind: input, shape index: {}]   ;;  %s1308_s4 = inlined_call_operand.hbm [shape: f32[2,16,16,128], index: 4, kind: output, shape index: {}]  }
   0x1   :  { %11 = vsyncpa [#allocation3 + $0x1], 0  ;;  %s1033_s15 = smov 0   ;;  %s1035_s16 = smov 0  }
   0x2   :  { %s1037_s17 = smov 0   ;;  %s1039_s18 = smov 0  }
   0x3   :  { %s1041_s19 = smov 0   ;;  %s1043_s20 = smov 0  }
   0x4 LB: > { %s812_s21 = sadd.s32 4294967295, %s1004_s20   ;;  %s813_s22 = sadd.s32 4294967294, %s1004_s20   ;;  %s1004_s20 = sphi %s1043_s20, %s17_s20   ;;  %s1000_s19 = sphi %s1041_s19, %s1315_s19   ;;  %s996_s18 = sphi %s1039_s18, %s1314_s18   ;;  %s992_s17 = sphi %s1037_s17, %s1313_s17   ;;  %s988_s16 = sphi %s1035_s16, %s1312_s16   ;;  %s984_s15 = sphi %s1033_s15, %s1311_s15  }
   0x5   : > { %s29_s23 = sadd.s32 1, %s1000_s19  ;;  %s141_s24 = sadd.s32 1, %s992_s17 }
   0x6   : > { %p31_p0 = scmp.ge.s32.totalorder %s29_s23, 2  ;;  %p151_p1 = scmp.ne.s32.totalorder %s992_s17, %s988_s16 }
   0x7   : > { %p152_p2 = scmp.eq.s32.totalorder %s812_s21, 1  ;;  %p157_p3 = scmp.ne.s32.totalorder %s988_s16, %s984_s15 }
   0x8   : > { %s1317_s23 = smov (%p31_p0, %s29_s23), 0  ;;  %p158_p5 = scmp.eq.s32.totalorder %s813_s22, 1 }
   0x9   : > { %p1073_p4 = por %p152_p2, %p151_p1  ;;  %s136_s26 = ssub.s32 %s1000_s19, %s1317_s23 }
   0xa   : > { %p816_p6 = scmp.ge.s32.totalorder %s1004_s20, 1  ;;  %p139_p7 = scmp.eq.s32.totalorder %s136_s26, 0 }
   0xb   : > { %p1080_p8 = por %p158_p5, %p157_p3  ;;  %p214_p9 = scmp.lt.s32.totalorder %s1004_s20, 3 }
   0xc   : > { %s1086_s28 = scalar_select %p139_p7, %s992_s17, %s141_s24  }
   0xd   : > { %p215_p10 = pnand %p816_p6, %p214_p9 }
   0xe   : > { %p260_p11 = scmp.lt.s32.totalorder (!%p215_p10), %s996_s18, 1  ;;  %s256_s14 = sand.u32 (!%p215_p10), 1, %s988_s16  }
   0xf   : > { %218 = sbr.rel (%p215_p10) target bundleno = 222 (0xde), region = 36  ;;  %s817_s26 = sshll.u32 (!%p215_p10), %s256_s14, 8 }
  0x10   : > { %s1187_s29 = scalar_lea.vmem (!%p215_p10), [#allocation2], %s817_s26  ;;  %s865_s30 = sshll.u32 (!%p215_p10), %s996_s18, 8 }
  0x11   : > { %s696_s7 = scalar_lea.hbm (!%p215_p10), %s1308_s4, %s865_s30  ;;  %s946_s21 = scalar_lea.hbm (!%p215_p10), %s1308_s4, 512 }
  0x12   : > { %s699_s8 = sshll.u32 (!%p215_p10), %s696_s7, 4  ;;  %s700_s8 = int_to_ptr.hbm [resolvable:$true] %s699_s8 }
  0x14   : > { %v318_v0 = vld [vmem:[%s1307_s3] sm:$0xf]  ;;  %vm416_vm0 = vcmask 1043456   ;;  %s1093_s5 = scalar_select %p260_p11, %s996_s18, 1  ;;  %vm319_vm1 = vcmask 31744  }
  0x15   : > { %867 = vmatpush.msk.msra.mxu2 %vm416_vm0, %v318_v0  ;;  %868 = vmatpush.msk.msra.mxu3 %vm416_vm0, %v318_v0  ;;  %s697_s18 = sshll.u32 %s1187_s29, 4  ;;  %s698_s18 = int_to_ptr.vmem [resolvable:$true] %s697_s18 }
  0x16   : > { %824 = vmatpush.msk.msra.mxu0 %vm416_vm0, %v318_v0  ;;  %866 = vmatpush.msk.msra.mxu1 %vm416_vm0, %v318_v0  ;;  %s862_s6 = sshll.u32 %s1093_s5, 8  ;;  %s863_s10 = sshll.u32 %s1093_s5, 4 }
  0x17   : > { %s1099_s9 = scalar_lea.vmem %s1304_s0, %s862_s6  ;;  %s278_s13 = scalar_lea.vmem %s1305_s1, %s863_s10 }
  0x18   : > { %v302_v1 = vld [vmem:[%s1099_s9 + $0x80] sm:$0xff]  ;;  %v303_v5 = vld [vmem:[%s1099_s9 + $0x88] sm:$0xff]  ;;  %v304_v9 = vld [vmem:[%s1099_s9 + $0x90] sm:$0xff]  ;;  %s284_s24 = scalar_lea.vmem %s1306_s2, %s863_s10  ;;  %s940_s10 = sshra.s32 %s700_s8, 4  ;;  %s941_s10 = int_to_ptr.hbm [resolvable:$true] %s940_s10 }
  0x19   : > { %v310_v2 = vld [vmem:[%s1099_s9 + $0xc0] sm:$0xff]  ;;  %841 = vmatmul.msk.f32.vlgmr.msra.gmra.mxu2 %vm319_vm1, %v302_v1  ;;  %v311_v6 = vld [vmem:[%s1099_s9 + $0xc8] sm:$0xff]  ;;  %v312_v10 = vld [vmem:[%s1099_s9 + $0xd0] sm:$0xff]  ;;  %s942_s11 = scalar_lea.hbm %s941_s10, 256  ;;  %p947_p1 = scmp.lt.s32.totalorder %s941_s10, %s1308_s4 }
  0x1a   : > { %v286_v3 = vld [vmem:[%s1099_s9] sm:$0xff]  ;;  %849 = vmatmul.msk.f32.vlgmr.msra.gmra.mxu3 %vm319_vm1, %v310_v2  ;;  %v287_v7 = vld [vmem:[%s1099_s9 + $0x8] sm:$0xff]  ;;  %v288_v11 = vld [vmem:[%s1099_s9 + $0x10] sm:$0xff]  ;;  %p943_p12 = scmp.ne.s32.totalorder %s941_s10, %s942_s11  ;;  %p948_p2 = scmp.lt.s32.totalorder %s946_s21, %s942_s11 }
  0x1b   : > { %v294_v4 = vld [vmem:[%s1099_s9 + $0x40] sm:$0xff]  ;;  %825 = vmatmul.msk.f32.vlgmr.msra.gmra.mxu0 %vm319_vm1, %v286_v3  ;;  %v295_v8 = vld [vmem:[%s1099_s9 + $0x48] sm:$0xff]  ;;  %v296_v12 = vld [vmem:[%s1099_s9 + $0x50] sm:$0xff] }
  0x1c   : > { %833 = vmatmul.msk.f32.vlgmr.msra.gmra.mxu1 %vm319_vm1, %v294_v4  ;;  %v305_v13 = vld [vmem:[%s1099_s9 + $0x98] sm:$0xff]  ;;  %v306_v17 = vld [vmem:[%s1099_s9 + $0xa0] sm:$0xff]  ;;  %v307_v21 = vld [vmem:[%s1099_s9 + $0xa8] sm:$0xff]  ;;  %p944_p13 = pnand %p943_p12, %p1073_p4  ;;  %p949_p3 = por %p948_p2, %p947_p1 }
  0x1d   : > { %v313_v14 = vld [vmem:[%s1099_s9 + $0xd8] sm:$0xff]  ;;  %v314_v18 = vld [vmem:[%s1099_s9 + $0xe0] sm:$0xff]  ;;  %v315_v22 = vld [vmem:[%s1099_s9 + $0xe8] sm:$0xff] }
  0x1e   : > { %v289_v15 = vld [vmem:[%s1099_s9 + $0x18] sm:$0xff]  ;;  %v290_v19 = vld [vmem:[%s1099_s9 + $0x20] sm:$0xff]  ;;  %v291_v23 = vld [vmem:[%s1099_s9 + $0x28] sm:$0xff]  ;;  %p945_p0 = pneg %p944_p13 }
  0x1f   : > { %v297_v16 = vld [vmem:[%s1099_s9 + $0x58] sm:$0xff]  ;;  %v298_v20 = vld [vmem:[%s1099_s9 + $0x60] sm:$0xff]  ;;  %v299_v24 = vld [vmem:[%s1099_s9 + $0x68] sm:$0xff] }
  0x20   : > { %v308_v25 = vld [vmem:[%s1099_s9 + $0xb0] sm:$0xff]  ;;  %v309_v29 = vld [vmem:[%s1099_s9 + $0xb8] sm:$0xff]  ;;  %v1169_v33 = vld [vmem:[%s278_s13] sm:$0xff]  ;;  %p950_p5 = pnand %p949_p3, %p945_p0 }
  0x21   : > { %842 = vmatmul.msk.f32.gmra.mxu2 %vm319_vm1, %v303_v5  ;;  %v316_v26 = vld [vmem:[%s1099_s9 + $0xf0] sm:$0xff]  ;;  %v317_v30 = vld [vmem:[%s1099_s9 + $0xf8] sm:$0xff]  ;;  %v540_v34 = vrot.slane %v1169_v33, 4  ;;  %v1172_v35 = vld [vmem:[%s278_s13 + $0x8] sm:$0xff]  ;;  %v551_v36 = vperm.slane %v1169_v33, 0  ;;  %v537_v59 = vrot.slane %v1169_v33, 1 }
  0x22   : > { %850 = vmatmul.msk.f32.gmra.mxu3 %vm319_vm1, %v311_v6  ;;  %v292_v27 = vld [vmem:[%s1099_s9 + $0x30] sm:$0xff]  ;;  %v293_v31 = vld [vmem:[%s1099_s9 + $0x38] sm:$0xff]  ;;  %v547_v38 = vrot.slane %v1172_v35, 4  ;;  %v1182_v40 = vld [vmem:[%s284_s24] sm:$0xff]  ;;  %v559_v44 = vperm.slane %v1172_v35, 0  ;;  %v541_v60 = vrot.slane %v1169_v33, 5 }
  0x23   : > { %826 = vmatmul.msk.f32.gmra.mxu0 %vm319_vm1, %v287_v7  ;;  %v300_v28 = vld [vmem:[%s1099_s9 + $0x70] sm:$0xff]  ;;  %v301_v32 = vld [vmem:[%s1099_s9 + $0x78] sm:$0xff]  ;;  %v555_v37 = vperm.slane %v540_v34, 0  ;;  %v1191_v52 = vld [vmem:[%s284_s24 + $0x8] sm:$0xff]  ;;  %v552_v1 = vperm.slane %v537_v59, 0  ;;  %v544_v5 = vrot.slane %v1172_v35, 1 }
  0x24   : > { %834 = vmatmul.msk.f32.gmra.mxu1 %vm319_vm1, %v295_v8  ;;  %v563_v45 = vperm.slane %v547_v38, 0  ;;  %v556_v2 = vperm.slane %v541_v60, 0  ;;  %v548_v6 = vrot.slane %v1172_v35, 5  ;;  %s682_s9 = scalar_lea.sflag [#allocation3], %s256_s14 }
  0x29   : > { %843 = vmatmul.msk.f32.gmra.mxu2 %vm319_vm1, %v304_v9 }
  0x2a   : > { %851 = vmatmul.msk.f32.gmra.mxu3 %vm319_vm1, %v312_v10 }
  0x2b   : > { %827 = vmatmul.msk.f32.gmra.mxu0 %vm319_vm1, %v288_v11 }
  0x2c   : > { %835 = vmatmul.msk.f32.gmra.mxu1 %vm319_vm1, %v296_v12 }
  0x31   : > { %844 = vmatmul.msk.f32.gmra.mxu2 %vm319_vm1, %v305_v13  ;;  %v560_v13 = vperm.slane %v544_v5, 0 }
  0x32   : > { %852 = vmatmul.msk.f32.gmra.mxu3 %vm319_vm1, %v313_v14  ;;  %v564_v14 = vperm.slane %v548_v6, 0 }
  0x33   : > { %828 = vmatmul.msk.f32.gmra.mxu0 %vm319_vm1, %v289_v15 }
  0x34   : > { %836 = vmatmul.msk.f32.gmra.mxu1 %vm319_vm1, %v297_v16 }
  0x39   : > { %845 = vmatmul.msk.f32.gmra.mxu2 %vm319_vm1, %v306_v17 }
  0x3a   : > { %853 = vmatmul.msk.f32.gmra.mxu3 %vm319_vm1, %v314_v18 }
  0x3b   : > { %829 = vmatmul.msk.f32.gmra.mxu0 %vm319_vm1, %v290_v19 }
  0x3c   : > { %837 = vmatmul.msk.f32.gmra.mxu1 %vm319_vm1, %v298_v20 }
  0x41   : > { %846 = vmatmul.msk.f32.gmra.mxu2 %vm319_vm1, %v307_v21 }
  0x42   : > { %854 = vmatmul.msk.f32.gmra.mxu3 %vm319_vm1, %v315_v22 }
  0x43   : > { %830 = vmatmul.msk.f32.gmra.mxu0 %vm319_vm1, %v291_v23 }
  0x44   : > { %838 = vmatmul.msk.f32.gmra.mxu1 %vm319_vm1, %v299_v24 }
  0x49   : > { %847 = vmatmul.msk.f32.gmra.mxu2 %vm319_vm1, %v308_v25 }
  0x4a   : > { %855 = vmatmul.msk.f32.gmra.mxu3 %vm319_vm1, %v316_v26 }
  0x4b   : > { %831 = vmatmul.msk.f32.gmra.mxu0 %vm319_vm1, %v292_v27  ;;  %v538_v27 = vrot.slane %v1169_v33, 2 }
  0x4c   : > { %839 = vmatmul.msk.f32.gmra.mxu1 %vm319_vm1, %v300_v28  ;;  %v542_v28 = vrot.slane %v1169_v33, 6 }
  0x4d   : > { %v553_v34 = vperm.slane %v538_v27, 0 }
  0x51   : > { %848 = vmatmul.msk.f32.gmra.mxu2 %vm319_vm1, %v309_v29 }
  0x52   : > { %856 = vmatmul.msk.f32.gmra.mxu3 %vm319_vm1, %v317_v30 }
  0x53   : > { %832 = vmatmul.msk.f32.gmra.mxu0 %vm319_vm1, %v293_v31 }
  0x54   : > { %840 = vmatmul.msk.f32.gmra.mxu1 %vm319_vm1, %v301_v32 }
  0x98   : > { %v437_v39 = vpop.f32.mrf.mxu0 }
  0x99   : > { %v461_v41 = vpop.f32.mrf.mxu1  ;;  %v583_v42 = vadd.f32 %v551_v36, %v437_v39  ;;  %v545_v39 = vrot.slane %v1172_v35, 2 }
  0x9a   : > { %v591_v43 = vadd.f32 %v555_v37, %v461_v41  ;;  %v549_v41 = vrot.slane %v1172_v35, 6 }
  0x9b   : > { %v617_v46 = vadd.f32 %v1182_v40, %v583_v42 }
  0x9c   : > { %v625_v47 = vadd.f32 %v1182_v40, %v591_v43  ;;  %v485_v48 = vpop.f32.mrf.mxu2 }
  0x9d   : > { %649 = vst [vmem:[%s1187_s29] sm:$0xff] %v617_v46  ;;  %v509_v49 = vpop.f32.mrf.mxu3  ;;  %v599_v50 = vadd.f32 %v559_v44, %v485_v48  ;;  %v561_v48 = vperm.slane %v545_v39, 0 }
  0x9e   : > { %657 = vst [vmem:[%s1187_s29 + $0x40] sm:$0xff] %v625_v47  ;;  %v607_v51 = vadd.f32 %v563_v45, %v509_v49  ;;  %v565_v49 = vperm.slane %v549_v41, 0 }
  0x9f   : > { %v633_v53 = vadd.f32 %v1182_v40, %v599_v50 }
  0xa0   : > { %v641_v54 = vadd.f32 %v1182_v40, %v607_v51  ;;  %v440_v55 = vpop.f32.mrf.mxu0 }
  0xa1   : > { %v464_v56 = vpop.f32.mrf.mxu1  ;;  %v584_v57 = vadd.f32 %v551_v36, %v440_v55  ;;  %665 = vst [vmem:[%s1187_s29 + $0x80] sm:$0xff] %v633_v53  ;;  %v557_v36 = vperm.slane %v542_v28, 0 }
  0xa2   : > { %v592_v58 = vadd.f32 %v555_v37, %v464_v56  ;;  %673 = vst [vmem:[%s1187_s29 + $0xc0] sm:$0xff] %v641_v54 }
  0xa3   : > { %v618_v61 = vadd.f32 %v1191_v52, %v584_v57 }
  0xa4   : > { %v626_v62 = vadd.f32 %v1191_v52, %v592_v58  ;;  %v488_v63 = vpop.f32.mrf.mxu2 }
  0xa5   : > { %650 = vst [vmem:[%s1187_s29 + $0x8] sm:$0xff] %v618_v61  ;;  %v512_v0 = vpop.f32.mrf.mxu3  ;;  %v600_v3 = vadd.f32 %v559_v44, %v488_v63  ;;  %v539_v63 = vrot.slane %v1169_v33, 3 }
  0xa6   : > { %658 = vst [vmem:[%s1187_s29 + $0x48] sm:$0xff] %v626_v62  ;;  %v608_v4 = vadd.f32 %v563_v45, %v512_v0  ;;  %v543_v0 = vrot.slane %v1169_v33, 7  ;;  %v550_v33 = vrot.slane %v1172_v35, 7 }
  0xa7   : > { %v634_v7 = vadd.f32 %v1191_v52, %v600_v3  ;;  %v554_v5 = vperm.slane %v539_v63, 0 }
  0xa8   : > { %v642_v8 = vadd.f32 %v1191_v52, %v608_v4  ;;  %v443_v9 = vpop.f32.mrf.mxu0  ;;  %v558_v6 = vperm.slane %v543_v0, 0 }
  0xa9   : > { %v467_v10 = vpop.f32.mrf.mxu1  ;;  %v585_v11 = vadd.f32 %v552_v1, %v443_v9  ;;  %666 = vst [vmem:[%s1187_s29 + $0x88] sm:$0xff] %v634_v7  ;;  %v546_v9 = vrot.slane %v1172_v35, 3 }
  0xaa   : > { %v593_v12 = vadd.f32 %v556_v2, %v467_v10  ;;  %674 = vst [vmem:[%s1187_s29 + $0xc8] sm:$0xff] %v642_v8 }
  0xab   : > { %v619_v15 = vadd.f32 %v1182_v40, %v585_v11 }
  0xac   : > { %v627_v16 = vadd.f32 %v1182_v40, %v593_v12  ;;  %v491_v17 = vpop.f32.mrf.mxu2 }
  0xad   : > { %651 = vst [vmem:[%s1187_s29 + $0x10] sm:$0xff] %v619_v15  ;;  %v515_v18 = vpop.f32.mrf.mxu3  ;;  %v601_v19 = vadd.f32 %v560_v13, %v491_v17  ;;  %v566_v17 = vperm.slane %v550_v33, 0 }
  0xae   : > { %659 = vst [vmem:[%s1187_s29 + $0x50] sm:$0xff] %v627_v16  ;;  %v609_v20 = vadd.f32 %v564_v14, %v515_v18  ;;  %v562_v16 = vperm.slane %v546_v9, 0 }
  0xaf   : > { %v635_v21 = vadd.f32 %v1182_v40, %v601_v19 }
  0xb0   : > { %v643_v22 = vadd.f32 %v1182_v40, %v609_v20  ;;  %v446_v23 = vpop.f32.mrf.mxu0 }
  0xb1   : > { %v470_v24 = vpop.f32.mrf.mxu1  ;;  %v586_v25 = vadd.f32 %v552_v1, %v446_v23  ;;  %667 = vst [vmem:[%s1187_s29 + $0x90] sm:$0xff] %v635_v21 }
  0xb2   : > { %v594_v26 = vadd.f32 %v556_v2, %v470_v24  ;;  %675 = vst [vmem:[%s1187_s29 + $0xd0] sm:$0xff] %v643_v22 }
  0xb3   : > { %v620_v29 = vadd.f32 %v1191_v52, %v586_v25 }
  0xb4   : > { %v628_v30 = vadd.f32 %v1191_v52, %v594_v26  ;;  %v494_v31 = vpop.f32.mrf.mxu2 }
  0xb5   : > { %652 = vst [vmem:[%s1187_s29 + $0x18] sm:$0xff] %v620_v29  ;;  %v518_v32 = vpop.f32.mrf.mxu3  ;;  %v602_v37 = vadd.f32 %v560_v13, %v494_v31 }
  0xb6   : > { %660 = vst [vmem:[%s1187_s29 + $0x58] sm:$0xff] %v628_v30  ;;  %v610_v38 = vadd.f32 %v564_v14, %v518_v32 }
  0xb7   : > { %v636_v42 = vadd.f32 %v1191_v52, %v602_v37 }
  0xb8   : > { %v644_v43 = vadd.f32 %v1191_v52, %v610_v38  ;;  %v449_v44 = vpop.f32.mrf.mxu0 }
  0xb9   : > { %v473_v45 = vpop.f32.mrf.mxu1  ;;  %v587_v46 = vadd.f32 %v553_v34, %v449_v44  ;;  %668 = vst [vmem:[%s1187_s29 + $0x98] sm:$0xff] %v636_v42 }
  0xba   : > { %v595_v47 = vadd.f32 %v557_v36, %v473_v45  ;;  %676 = vst [vmem:[%s1187_s29 + $0xd8] sm:$0xff] %v644_v43 }
  0xbb   : > { %v621_v50 = vadd.f32 %v1182_v40, %v587_v46 }
  0xbc   : > { %v629_v51 = vadd.f32 %v1182_v40, %v595_v47  ;;  %v497_v53 = vpop.f32.mrf.mxu2 }
  0xbd   : > { %653 = vst [vmem:[%s1187_s29 + $0x20] sm:$0xff] %v621_v50  ;;  %v521_v54 = vpop.f32.mrf.mxu3  ;;  %v603_v55 = vadd.f32 %v561_v48, %v497_v53 }
  0xbe   : > { %661 = vst [vmem:[%s1187_s29 + $0x60] sm:$0xff] %v629_v51  ;;  %v611_v56 = vadd.f32 %v565_v49, %v521_v54 }
  0xbf   : > { %v637_v57 = vadd.f32 %v1182_v40, %v603_v55 }
  0xc0   : > { %v645_v58 = vadd.f32 %v1182_v40, %v611_v56  ;;  %v452_v59 = vpop.f32.mrf.mxu0 }
  0xc1   : > { %v476_v60 = vpop.f32.mrf.mxu1  ;;  %v588_v61 = vadd.f32 %v553_v34, %v452_v59  ;;  %669 = vst [vmem:[%s1187_s29 + $0xa0] sm:$0xff] %v637_v57 }
  0xc2   : > { %v596_v62 = vadd.f32 %v557_v36, %v476_v60  ;;  %677 = vst [vmem:[%s1187_s29 + $0xe0] sm:$0xff] %v645_v58 }
  0xc3   : > { %v622_v1 = vadd.f32 %v1191_v52, %v588_v61 }
  0xc4   : > { %v630_v2 = vadd.f32 %v1191_v52, %v596_v62  ;;  %v500_v3 = vpop.f32.mrf.mxu2 }
  0xc5   : > { %654 = vst [vmem:[%s1187_s29 + $0x28] sm:$0xff] %v622_v1  ;;  %v524_v4 = vpop.f32.mrf.mxu3  ;;  %v604_v7 = vadd.f32 %v561_v48, %v500_v3 }
  0xc6   : > { %662 = vst [vmem:[%s1187_s29 + $0x68] sm:$0xff] %v630_v2  ;;  %v612_v8 = vadd.f32 %v565_v49, %v524_v4 }
  0xc7   : > { %v638_v10 = vadd.f32 %v1191_v52, %v604_v7 }
  0xc8   : > { %v646_v11 = vadd.f32 %v1191_v52, %v612_v8  ;;  %v455_v12 = vpop.f32.mrf.mxu0 }
  0xc9   : > { %v479_v13 = vpop.f32.mrf.mxu1  ;;  %v589_v14 = vadd.f32 %v554_v5, %v455_v12  ;;  %670 = vst [vmem:[%s1187_s29 + $0xa8] sm:$0xff] %v638_v10 }
  0xca   : > { %v597_v15 = vadd.f32 %v558_v6, %v479_v13  ;;  %678 = vst [vmem:[%s1187_s29 + $0xe8] sm:$0xff] %v646_v11 }
  0xcb   : > { %v623_v18 = vadd.f32 %v1182_v40, %v589_v14 }
  0xcc   : > { %v631_v19 = vadd.f32 %v1182_v40, %v597_v15  ;;  %v503_v35 = vpop.f32.mrf.mxu2 }
  0xcd   : > { %655 = vst [vmem:[%s1187_s29 + $0x30] sm:$0xff] %v623_v18  ;;  %v527_v20 = vpop.f32.mrf.mxu3  ;;  %v605_v21 = vadd.f32 %v562_v16, %v503_v35 }
  0xce   : > { %663 = vst [vmem:[%s1187_s29 + $0x70] sm:$0xff] %v631_v19  ;;  %v613_v22 = vadd.f32 %v566_v17, %v527_v20 }
  0xcf   : > { %v639_v23 = vadd.f32 %v1182_v40, %v605_v21 }
  0xd0   : > { %v647_v24 = vadd.f32 %v1182_v40, %v613_v22  ;;  %v458_v25 = vpop.f32.mrf.mxu0 }
  0xd1   : > { %v482_v26 = vpop.f32.mrf.mxu1  ;;  %v590_v27 = vadd.f32 %v554_v5, %v458_v25  ;;  %671 = vst [vmem:[%s1187_s29 + $0xb0] sm:$0xff] %v639_v23 }
  0xd2   : > { %v598_v28 = vadd.f32 %v558_v6, %v482_v26  ;;  %679 = vst [vmem:[%s1187_s29 + $0xf0] sm:$0xff] %v647_v24 }
  0xd3   : > { %v624_v29 = vadd.f32 %v1191_v52, %v590_v27 }
  0xd4   : > { %v632_v30 = vadd.f32 %v1191_v52, %v598_v28  ;;  %v506_v31 = vpop.f32.mrf.mxu2 }
  0xd5   : > { %656 = vst [vmem:[%s1187_s29 + $0x38] sm:$0xff] %v624_v29  ;;  %v530_v40 = vpop.f32.mrf.mxu3  ;;  %v606_v32 = vadd.f32 %v562_v16, %v506_v31 }
  0xd6   : > { %664 = vst [vmem:[%s1187_s29 + $0x78] sm:$0xff] %v632_v30  ;;  %v614_v34 = vadd.f32 %v566_v17, %v530_v40 }
  0xd7   : > { %v640_v36 = vadd.f32 %v1191_v52, %v606_v32 }
  0xd8   : > { %v648_v37 = vadd.f32 %v1191_v52, %v614_v34 }
  0xd9   : > { %672 = vst [vmem:[%s1187_s29 + $0xb8] sm:$0xff] %v640_v36 }
  0xda   : > { %680 = vst [vmem:[%s1187_s29 + $0xf8] sm:$0xff] %v648_v37 }
  0xdb   : > { %953 = shalt.err (!%p950_p5)
}
  0xdc   : > { %s1006_s14 = smov 128   ;;  %s1007_s26 = smov 8  }
  0xdd   : > { %869 = dma.vmem_to_hbm [thread:$0]  (%p1073_p4), %s698_s18, 4096, %s700_s8, %s682_s9, %s1006_s14, %s1006_s14, %s1007_s26  }
  0xde PF: > { %p875_p6 = scmp.ge.s32.totalorder %s1004_s20, 2  ;;  %s714_s29 = sand.u32 1, %s984_s15  }
  0xdf   : > { %s715_s30 = scalar_lea.sflag [#allocation3], %s714_s29 }
  0xe0   : > { %p872_p7 = pnand %p875_p6, %p1080_p8 }
  0xe2   : > { %p873_p9 = pneg %p872_p7 }
  0xe4   : > { %979 = dma.done.wait (%p873_p9), %s715_s30, 4096  }
  0xe5   : > { %981 = vsyncadd (%p873_p9), %s715_s30, 4294963200  ;;  %s17_s20 = sadd.s32 1, %s1004_s20   ;;  %s1311_s15 = smov %s988_s16 }
  0xe6   : > { %p14_p10 = scmp.ge.s32.totalorder %s17_s20, 4   ;;  %s1312_s16 = smov %s992_s17 }
  0xe7   : > { %s1313_s17 = smov %s1086_s28  ;;  %s1314_s18 = smov %s1000_s19 }
  0xe8   : > { %s1315_s19 = smov %s1317_s23  ;;  %16 = sbr.rel (!%p14_p10) target bundleno = 4 (0x4), region = 77 }
  0xed   :  { %721 = vsyncpa [#allocation3], 1 }
  0xee   :  { %723 = vsyncpa [#allocation3 + $0x1], 1 }

</bundles_post_ra>
